<compile_context>
chip_gen: v7x
topology: tpu7x:2x2x1
jax: 0.10.0
libtpu: 0.0.40
codegen_flags: <defaults>
</compile_context>

<pallas_src>
import functools
import math

import jax
import jax.numpy as jnp
from jax.experimental import pallas as pl
from jax.experimental.pallas import tpu as pltpu


def _round_up(x: int, m: int) -> int:
    return ((x + m - 1) // m) * m


def _focus_stats_kernel(x_ref, w_ref, sum_ref, sq_ref):
    """Accumulate per-lane sum(y) and sum(y*y) for y = X @ W across row tiles."""
    @pl.when(pl.program_id(0) == 0)
    def _():
        sum_ref[...] = jnp.zeros_like(sum_ref)
        sq_ref[...] = jnp.zeros_like(sq_ref)

    y = jnp.dot(x_ref[...], w_ref[...], preferred_element_type=jnp.float32)
    sum_ref[...] += jnp.sum(y, axis=0, keepdims=True)
    sq_ref[...] += jnp.sum(y * y, axis=0, keepdims=True)


def _focus_apply_kernel(x_ref, w_ref, shift_ref, o_ref, *, negative_slope: float):
    """y = X @ (W*scale) + shift, then LeakyReLU (scale pre-folded into W)."""
    y = jnp.dot(x_ref[...], w_ref[...], preferred_element_type=jnp.float32)
    y = y + shift_ref[...]
    o_ref[...] = jnp.where(y >= 0, y, negative_slope * y).astype(o_ref.dtype)


def focus_forward(x_nchw, weight, gamma, beta, *,
                  negative_slope: float = 0.01, eps: float = 1e-5,
                  tile_rows=None):
    """Focus.forward for k=1, s=1, g=1 (the module defaults), training-mode BN.

    x_nchw : (B, C1, H, W) float32, H and W even
    weight : (C2, 4*C1, 1, 1) conv weight (no bias)
    gamma, beta : (C2,) BatchNorm affine parameters
    returns: (B, C2, H/2, W/2) float32
    """
    B, C1, H, W = x_nchw.shape
    assert H % 2 == 0 and W % 2 == 0
    H2, W2 = H // 2, W // 2
    K = 4 * C1
    N = weight.shape[0]
    M = B * H2 * W2

    # --- single fused relayout: space-to-depth + channels-last flatten ------
    # torch channel order is (2*wpar + hpar)*C1 + c -> transpose to
    # (B, h2, w2, wpar, hpar, c).
    x6 = x_nchw.reshape(B, C1, H2, 2, W2, 2)
    x_mat = jnp.transpose(x6, (0, 2, 4, 5, 3, 1)).reshape(M, K).astype(jnp.float32)
    w_mat = jnp.transpose(weight.reshape(N, K), (1, 0)).astype(jnp.float32)  # (K, N)

    # --- choose lane-packing factor G (output last dim multiple of 128) ------
    if N % 128 == 0:
        G = 1
    else:
        g = 128 // math.gcd(N, 128)
        G = g if g <= 32 else 1          # cap flop blow-up; fall back to padding

    if G > 1:
        KG, NG = G * K, G * N
        Mg = _round_up(M, G)
        if Mg != M:
            x_mat = jnp.pad(x_mat, ((0, Mg - M), (0, 0)))   # zero rows: stats-safe
        x_pack = x_mat.reshape(Mg // G, KG)                  # contiguous reshape
        w_eff = jnp.kron(jnp.eye(G, dtype=jnp.float32), w_mat)   # (KG, NG) block-diag
        rows = Mg // G
    else:
        KG = K
        NG = _round_up(N, 128)
        x_pack = x_mat
        w_eff = jnp.pad(w_mat, ((0, 0), (0, NG - N))) if NG != N else w_mat
        rows = M

    # --- row tiling (target ~2 MiB per buffered stream) ----------------------
    if tile_rows is None:
        budget = 2 << 20
        tile_rows = max(8, min(4096, (budget // ((KG + NG) * 4)) // 8 * 8))
    TILE_R = _round_up(min(int(tile_rows), _round_up(rows, 8)), 8)
    rows_pad = _round_up(rows, TILE_R)
    if rows_pad != rows:
        x_pack = jnp.pad(x_pack, ((0, rows_pad - rows), (0, 0)))
    n_tiles = rows_pad // TILE_R

    # --- pass 1: per-lane statistics of y = X @ W ----------------------------
    sum_p, sq_p = pl.pallas_call(
        _focus_stats_kernel,
        out_shape=(jax.ShapeDtypeStruct((1, NG), jnp.float32),
                   jax.ShapeDtypeStruct((1, NG), jnp.float32)),
        grid=(n_tiles,),
        in_specs=[
            pl.BlockSpec((TILE_R, KG), lambda i: (i, 0)),
            pl.BlockSpec((KG, NG), lambda i: (0, 0)),
        ],
        out_specs=[
            pl.BlockSpec((1, NG), lambda i: (0, 0)),
            pl.BlockSpec((1, NG), lambda i: (0, 0)),
        ],
        compiler_params=pltpu.CompilerParams(
            dimension_semantics=("arbitrary",)),
        cost_estimate=pl.CostEstimate(
            flops=2 * rows_pad * KG * NG + 3 * rows_pad * NG,
            transcendentals=0,
            bytes_accessed=4 * (rows_pad * KG + KG * NG + 2 * NG)),
    )(x_pack, w_eff)

    # --- fold BN into per-channel scale/shift (tiny, plain JAX) --------------
    if G > 1:
        sum_y = jnp.sum(sum_p.reshape(G, N), axis=0)
        sq_y = jnp.sum(sq_p.reshape(G, N), axis=0)
    else:
        sum_y = sum_p[0, :N]
        sq_y = sq_p[0, :N]

    mean = sum_y / M                                        # true M as divisor
    var = jnp.maximum(sq_y / M - mean * mean, 0.0)          # biased variance
    scale = gamma.astype(jnp.float32) * jax.lax.rsqrt(var + eps)
    shift = beta.astype(jnp.float32) - mean * scale

    if G > 1:
        w_apply = w_eff * jnp.tile(scale, G)[None, :]       # fold scale into W
        shift_row = jnp.tile(shift, G).reshape(1, NG)
    else:
        scale_p = jnp.pad(scale, (0, NG - N)) if NG != N else scale
        shift_p = jnp.pad(shift, (0, NG - N)) if NG != N else shift
        w_apply = w_eff * scale_p[None, :]
        shift_row = shift_p.reshape(1, NG)

    # --- pass 2: recompute matmul per tile, add shift, LeakyReLU -------------
    apply_kernel = functools.partial(_focus_apply_kernel,
                                     negative_slope=negative_slope)
    out_pack = pl.pallas_call(
        apply_kernel,
        out_shape=jax.ShapeDtypeStruct((rows_pad, NG), jnp.float32),
        grid=(n_tiles,),
        in_specs=[
            pl.BlockSpec((TILE_R, KG), lambda i: (i, 0)),
            pl.BlockSpec((KG, NG), lambda i: (0, 0)),
            pl.BlockSpec((1, NG), lambda i: (0, 0)),
        ],
        out_specs=pl.BlockSpec((TILE_R, NG), lambda i: (i, 0)),
        compiler_params=pltpu.CompilerParams(
            dimension_semantics=("parallel",)),   # shards across v7x's 2 TCs
        cost_estimate=pl.CostEstimate(
            flops=2 * rows_pad * KG * NG + 3 * rows_pad * NG,
            transcendentals=0,
            bytes_accessed=4 * (rows_pad * KG + KG * NG + rows_pad * NG + NG)),
    )(x_pack, w_apply, shift_row)

    # --- unpack back to NCHW --------------------------------------------------
    if G > 1:
        out_mat = out_pack.reshape(rows_pad * G, N)[:M]     # contiguous reshape
    else:
        out_mat = out_pack[:M, :N]
    out = out_mat.reshape(B, H2, W2, N)
    return jnp.transpose(out, (0, 3, 1, 2))

    # TODO(synk): general k>1 convolution path not implemented (Focus default is
    # k=1, a 1x1 conv); BatchNorm running_mean/running_var buffer updates
    # (training-mode side effects) are not reproduced, only the forward output.


def _reference_forward(x_nchw, weight, gamma, beta,
                       negative_slope=0.01, eps=1e-5):
    """Pure-JAX reference matching the PyTorch forward (training-mode BN)."""
    p0 = x_nchw[..., ::2, ::2]
    p1 = x_nchw[..., 1::2, ::2]
    p2 = x_nchw[..., ::2, 1::2]
    p3 = x_nchw[..., 1::2, 1::2]
    xc = jnp.concatenate([p0, p1, p2, p3], axis=1)            # (B, 4C1, H2, W2)
    w = weight.reshape(weight.shape[0], weight.shape[1])      # (C2, 4C1)
    y = jnp.einsum('bkhw,nk->bnhw', xc, w)
    mean = jnp.mean(y, axis=(0, 2, 3), keepdims=True)
    var = jnp.mean((y - mean) ** 2, axis=(0, 2, 3), keepdims=True)
    y = (y - mean) / jnp.sqrt(var + eps)
    y = y * gamma.reshape(1, -1, 1, 1) + beta.reshape(1, -1, 1, 1)
    return jnp.where(y >= 0, y, negative_slope * y)


if __name__ == "__main__":
    # Focus(c1=4, c2=8) with default k=1, s=1, g=1, act=LeakyReLU(0.01)
    B, C1, H, W = 2, 4, 16, 16
    C2 = 8

    key = jax.random.PRNGKey(0)
    kx, kw, kg, kb = jax.random.split(key, 4)

    x = jax.random.normal(kx, (B, C1, H, W), dtype=jnp.float32)
    weight = 0.1 * jax.random.normal(kw, (C2, 4 * C1, 1, 1), dtype=jnp.float32)
    gamma = 1.0 + 0.1 * jax.random.normal(kg, (C2,), dtype=jnp.float32)
    beta = 0.1 * jax.random.normal(kb, (C2,), dtype=jnp.float32)

    ref = _reference_forward(x, weight, gamma, beta)
    out = jax.block_until_ready(focus_forward(x, weight, gamma, beta))
    assert out.shape == (B, C2, H // 2, W // 2)
    assert jnp.allclose(out, ref, atol=1e-4, rtol=1e-4), "mismatch vs reference"

    # Multi-tile (grid > 1) cross-tile statistics path: larger spatial, tiny tile.
    x2 = jax.random.normal(jax.random.PRNGKey(1), (2, 4, 32, 32), dtype=jnp.float32)
    ref2 = _reference_forward(x2, weight, gamma, beta)
    out2 = jax.block_until_ready(
        focus_forward(x2, weight, gamma, beta, tile_rows=8))
    assert jnp.allclose(out2, ref2, atol=1e-4, rtol=1e-4), "multi-tile mismatch"

    # Odd channel count exercises the padded-lane fallback path (G == 1).
    w7 = 0.1 * jax.random.normal(jax.random.PRNGKey(2), (7, 4 * C1, 1, 1),
                                 dtype=jnp.float32)
    g7 = 1.0 + 0.1 * jax.random.normal(jax.random.PRNGKey(3), (7,), jnp.float32)
    b7 = 0.1 * jax.random.normal(jax.random.PRNGKey(4), (7,), jnp.float32)
    ref3 = _reference_forward(x, w7, g7, b7)
    out3 = jax.block_until_ready(focus_forward(x, w7, g7, b7))
    assert jnp.allclose(out3, ref3, atol=1e-4, rtol=1e-4), "fallback mismatch"

    print("KERNEL_OK")
</pallas_src>

<mosaic_0001>
module attributes {stable_mosaic.version = 11 : i64} {
  func.func @_focus_stats_kernel(%arg0: i32, %arg1: memref<8x256xf32, #tpu.memory_space<vmem>>, %arg2: memref<256x128xf32, #tpu.memory_space<vmem>>, %arg3: memref<1x128xf32, #tpu.memory_space<vmem>>, %arg4: memref<1x128xf32, #tpu.memory_space<vmem>>) attributes {dimension_semantics = [#tpu.dimension_semantics<arbitrary>], iteration_bounds = array<i64: 1>, scalar_prefetch = 0 : i64, scratch_operands = 0 : i64, tpu.core_type = #tpu.core_type<tc>, window_params = [{transform_indices = @transform_0, window_bounds = array<i64: 8, 256>}, {pipeline_mode = #tpu.pipeline_mode<synchronous>, transform_indices = @transform_1, window_bounds = array<i64: 256, 128>}, {pipeline_mode = #tpu.pipeline_mode<synchronous>, transform_indices = @transform_2, window_bounds = array<i64: 1, 128>}, {pipeline_mode = #tpu.pipeline_mode<synchronous>, transform_indices = @transform_3, window_bounds = array<i64: 1, 128>}]} {
    %c0_i32 = arith.constant 0 : i32
    %0 = arith.cmpi eq, %arg0, %c0_i32 : i32
    %1 = arith.extui %0 : i1 to i32
    %c0_i32_0 = arith.constant 0 : i32
    %2 = arith.cmpi ne, %1, %c0_i32_0 : i32
    scf.if %2 {
      %cst_14 = arith.constant 0.000000e+00 : f32
      %17 = vector.broadcast %cst_14 : f32 to vector<1x128xf32>
      %c0_15 = arith.constant 0 : index
      %c0_16 = arith.constant 0 : index
      %18 = vector.load %arg3[%c0_15, %c0_16] : memref<1x128xf32, #tpu.memory_space<vmem>>, vector<1x128xf32>
      tpu.vector_store %arg3[%c0_15, %c0_16], %17 {strides = array<i32>} : memref<1x128xf32, #tpu.memory_space<vmem>>, vector<1x128xf32>,
      %cst_17 = arith.constant 0.000000e+00 : f32
      %19 = vector.broadcast %cst_17 : f32 to vector<1x128xf32>
      %c0_18 = arith.constant 0 : index
      %c0_19 = arith.constant 0 : index
      %20 = vector.load %arg4[%c0_18, %c0_19] : memref<1x128xf32, #tpu.memory_space<vmem>>, vector<1x128xf32>
      tpu.vector_store %arg4[%c0_18, %c0_19], %19 {strides = array<i32>} : memref<1x128xf32, #tpu.memory_space<vmem>>, vector<1x128xf32>,
    } else {
    }
    %c0 = arith.constant 0 : index
    %c0_1 = arith.constant 0 : index
    %3 = vector.load %arg1[%c0, %c0_1] : memref<8x256xf32, #tpu.memory_space<vmem>>, vector<8x256xf32>
    %c0_2 = arith.constant 0 : index
    %c0_3 = arith.constant 0 : index
    %4 = vector.load %arg2[%c0_2, %c0_3] : memref<256x128xf32, #tpu.memory_space<vmem>>, vector<256x128xf32>
    %cst = arith.constant dense<0.000000e+00> : vector<8x128xf32>
    %5 = tpu.matmul %3, %4, %cst {dimension_numbers = #tpu.dot_dimension_numbers<[1], [0], [0], [1], [0, 0, 1, 1], [], []>} : vector<8x256xf32>, vector<256x128xf32>, vector<8x128xf32> -> vector<8x128xf32>
    %c0_4 = arith.constant 0 : index
    %c0_5 = arith.constant 0 : index
    %6 = vector.load %arg3[%c0_4, %c0_5] : memref<1x128xf32, #tpu.memory_space<vmem>>, vector<1x128xf32>
    %cst_6 = arith.constant dense<0.000000e+00> : vector<128xf32>
    %7 = vector.multi_reduction <add>, %5, %cst_6 [0] : vector<8x128xf32> to vector<128xf32>
    %8 = vector.shape_cast %7 : vector<128xf32> to vector<1x128xf32>
    %9 = arith.addf %6, %8 : vector<1x128xf32>
    %c0_7 = arith.constant 0 : index
    %c0_8 = arith.constant 0 : index
    %10 = vector.load %arg3[%c0_7, %c0_8] : memref<1x128xf32, #tpu.memory_space<vmem>>, vector<1x128xf32>
    tpu.vector_store %arg3[%c0_7, %c0_8], %9 {strides = array<i32>} : memref<1x128xf32, #tpu.memory_space<vmem>>, vector<1x128xf32>,
    %c0_9 = arith.constant 0 : index
    %c0_10 = arith.constant 0 : index
    %11 = vector.load %arg4[%c0_9, %c0_10] : memref<1x128xf32, #tpu.memory_space<vmem>>, vector<1x128xf32>
    %12 = arith.mulf %5, %5 : vector<8x128xf32>
    %cst_11 = arith.constant dense<0.000000e+00> : vector<128xf32>
    %13 = vector.multi_reduction <add>, %12, %cst_11 [0] : vector<8x128xf32> to vector<128xf32>
    %14 = vector.shape_cast %13 : vector<128xf32> to vector<1x128xf32>
    %15 = arith.addf %11, %14 : vector<1x128xf32>
    %c0_12 = arith.constant 0 : index
    %c0_13 = arith.constant 0 : index
    %16 = vector.load %arg4[%c0_12, %c0_13] : memref<1x128xf32, #tpu.memory_space<vmem>>, vector<1x128xf32>
    tpu.vector_store %arg4[%c0_12, %c0_13], %15 {strides = array<i32>} : memref<1x128xf32, #tpu.memory_space<vmem>>, vector<1x128xf32>,
    return
  }
  func.func @transform_0(%arg0: i32) -> (i32, i32) {
    %c0_i32 = arith.constant 0 : i32
    %c0_i32_0 = arith.constant 0 : i32
    return %arg0, %c0_i32 : i32, i32
  }
  func.func @transform_1(%arg0: i32) -> (i32, i32) {
    %c0_i32 = arith.constant 0 : i32
    %c0_i32_0 = arith.constant 0 : i32
    %c0_i32_1 = arith.constant 0 : i32
    return %c0_i32, %c0_i32_0 : i32, i32
  }
  func.func @transform_2(%arg0: i32) -> (i32, i32) {
    %c0_i32 = arith.constant 0 : i32
    %c0_i32_0 = arith.constant 0 : i32
    %c0_i32_1 = arith.constant 0 : i32
    return %c0_i32, %c0_i32_0 : i32, i32
  }
  func.func @transform_3(%arg0: i32) -> (i32, i32) {
    %c0_i32 = arith.constant 0 : i32
    %c0_i32_0 = arith.constant 0 : i32
    %c0_i32_1 = arith.constant 0 : i32
    return %c0_i32, %c0_i32_0 : i32, i32
  }
}

</mosaic_0001>

<bundles_post_ra>
// kernel: tpu_custom_call.1
= control target key start
LH: loop header
LB: loop body
LE: loop exit
PB: predicated region body
PF: predicated region fallthrough
CT: control target
= control target key end

     0   :  { %9 = vsyncpa [#allocation3], 0  ;;  %s460_s0 = inlined_call_operand.hbm [shape: f32[8,256], index: 0, kind: input, shape index: {}]   ;;  %s461_s1 = inlined_call_operand.hbm [shape: f32[256,128], index: 1, kind: input, shape index: {}]   ;;  %s462_s2 = inlined_call_operand.hbm [shape: f32[1,128], index: 2, kind: output, shape index: {0}]   ;;  %s463_s3 = inlined_call_operand.hbm [shape: f32[1,128], index: 3, kind: output, shape index: {1}]  }
   0x1   :  { %10 = vsyncpa [#allocation6], 0 }
   0x2   :  { %11 = vsyncpa [#allocation4], 0 }
   0x3   :  { %12 = vsyncpa [#allocation9], 0  ;;  %s370_s12 = smov [#allocation2]   ;;  %s371_s14 = smov [#allocation5]  }
   0x4   :  { %s19_s13 = sshll.u32 %s370_s12, 4  ;;  %s28_s15 = sshll.u32 %s371_s14, 4  ;;  %s20_s13 = int_to_ptr.vmem [resolvable:$true] %s19_s13  ;;  %s397_s15 = int_to_ptr.vmem [resolvable:$true] %s28_s15 }
   0x5   :  { %s274_s18 = scalar_lea.hbm %s460_s0, 256 }
   0x6   :  { %p275_p0 = scmp.ne.s32.totalorder %s460_s0, %s274_s18  ;;  %p278_p1 = scmp.lt.u32.totalorder %s274_s18, %s460_s0 }
   0x8   :  { %p280_p2 = pnand %p278_p1, %p275_p0 }
   0xa   :  { %283 = shalt.err (!%p280_p2)
}
   0xb   :  { %s284_s23 = scalar_lea.vmem %s20_s13, 256  ;;  %p289_p4 = scmp.lt.s32.totalorder %s20_s13, %s20_s13 }
   0xc   :  { %p285_p3 = scmp.ne.s32.totalorder %s20_s13, %s284_s23  ;;  %p290_p5 = scmp.lt.s32.totalorder %s284_s23, %s284_s23 }
   0xe   :  { %p291_p6 = por %p290_p5, %p289_p4 }
  0x10   :  { %p292_p7 = pnand %p291_p6, %p285_p3 }
  0x12   :  { %295 = shalt.err (!%p292_p7)
}
  0x13   :  { %22 = dma.hbm_to_vmem [thread:$0]  %s460_s0, 256, %s20_s13, [#allocation3]  }
  0x14   :  { %s296_s28 = scalar_lea.hbm %s461_s1, 4096 }
  0x15   :  { %p297_p8 = scmp.ne.s32.totalorder %s461_s1, %s296_s28  ;;  %p300_p9 = scmp.lt.u32.totalorder %s296_s28, %s461_s1 }
  0x17   :  { %p302_p10 = pnand %p300_p9, %p297_p8 }
  0x19   :  { %305 = shalt.err (!%p302_p10)
}
  0x1a   :  { %s306_s6 = scalar_lea.vmem %s397_s15, 4096  ;;  %p311_p12 = scmp.lt.s32.totalorder %s397_s15, %s397_s15 }
  0x1b   :  { %p307_p11 = scmp.ne.s32.totalorder %s397_s15, %s306_s6  ;;  %p312_p13 = scmp.lt.s32.totalorder %s306_s6, %s306_s6 }
  0x1d   :  { %p313_p0 = por %p312_p13, %p311_p12 }
  0x1f   :  { %p314_p1 = pnand %p313_p0, %p307_p11 }
  0x21   :  { %317 = shalt.err (!%p314_p1)
}
  0x22   :  { %s372_s0 = smov 128   ;;  %s373_s7 = smov 8  }
  0x23   :  { %34 = dma.hbm_to_vmem [thread:$0]  %s461_s1, 4096, %s397_s15, [#allocation6], %s372_s0, %s372_s0, %s373_s7  }
  0x24   :  { %362 = dma.done.wait [#allocation3], 256  }
  0x25   :  { %363 = vsyncadd [#allocation3], 4294967040 }
  0x26   :  { %364 = dma.done.wait [#allocation6], 4096  }
  0x27   :  { %365 = vsyncadd [#allocation6], 4294963200  ;;  %v65_v0 = vld [vmem:[#allocation5 + $0x80] sm:$0xff]  ;;  %v66_v1 = vld [vmem:[#allocation5 + $0x88] sm:$0xff]  ;;  %v374_v50 = vmov 0.0   ;;  %s375_s1 = smov [#allocation7]  }
  0x28   :  { %v49_v2 = vld [vmem:[#allocation5] sm:$0xff]  ;;  %v235_v3 = vpack.c.bf16 %v66_v1, %v65_v0  ;;  %v50_v4 = vld [vmem:[#allocation5 + $0x8] sm:$0xff]  ;;  %v67_v5 = vld [vmem:[#allocation5 + $0x90] sm:$0xff]  ;;  %45 = vst [vmem:[#allocation7] sm:$0x1] %v374_v50  ;;  %s176_s10 = sshll.u32 %s375_s1, 4  ;;  %s177_s10 = int_to_ptr.vmem [resolvable:$true] %s176_s10 }
  0x29   :  { %v68_v6 = vld [vmem:[#allocation5 + $0x98] sm:$0xff]  ;;  %v237_v7 = vpack.c.bf16 %v50_v4, %v49_v2  ;;  %v51_v9 = vld [vmem:[#allocation5 + $0x10] sm:$0xff]  ;;  %v69_v11 = vld [vmem:[#allocation5 + $0xa0] sm:$0xff]  ;;  %46 = vst [vmem:[#allocation8] sm:$0x1] %v374_v50  ;;  %s376_s11 = smov [#allocation8]   ;;  %p323_p3 = scmp.lt.s32.totalorder %s177_s10, %s177_s10 }
  0x2a   :  { %v239_v8 = vpack.c.bf16 %v68_v6, %v67_v5  ;;  %v52_v10 = vld [vmem:[#allocation5 + $0x18] sm:$0xff]  ;;  %236 = vmatprep.subr.bf16.mxu0 %v235_v3  ;;  %v70_v12 = vld [vmem:[#allocation5 + $0xa8] sm:$0xff]  ;;  %v53_v15 = vld [vmem:[#allocation5 + $0x20] sm:$0xff]  ;;  %s186_s12 = sshll.u32 %s376_s11, 4  ;;  %s318_s13 = scalar_lea.vmem %s177_s10, 16  ;;  %s428_s12 = int_to_ptr.vmem [resolvable:$true] %s186_s12 }
  0x2b   :  { %238 = vmatpush3.bf16.msra.mxu0 %v237_v7  ;;  %v241_v13 = vpack.c.bf16 %v52_v10, %v51_v9  ;;  %v243_v14 = vpack.c.bf16 %v70_v12, %v69_v11  ;;  %v54_v16 = vld [vmem:[#allocation5 + $0x28] sm:$0xff]  ;;  %v71_v17 = vld [vmem:[#allocation5 + $0xb0] sm:$0xff]  ;;  %v72_v18 = vld [vmem:[#allocation5 + $0xb8] sm:$0xff]  ;;  %p319_p2 = scmp.ne.s32.totalorder %s177_s10, %s318_s13  ;;  %s322_s14 = scalar_lea.vmem %s177_s10, 32 }
  0x2c   :  { %240 = vmatprep.subr.bf16.mxu0 %v239_v8  ;;  %v245_v19 = vpack.c.bf16 %v54_v16, %v53_v15  ;;  %v247_v20 = vpack.c.bf16 %v72_v18, %v71_v17  ;;  %v55_v21 = vld [vmem:[#allocation5 + $0x30] sm:$0xff]  ;;  %v56_v22 = vld [vmem:[#allocation5 + $0x38] sm:$0xff]  ;;  %v73_v23 = vld [vmem:[#allocation5 + $0xc0] sm:$0xff]  ;;  %p324_p4 = scmp.lt.s32.totalorder %s322_s14, %s318_s13 }
  0x2d   :  { %v74_v24 = vld [vmem:[#allocation5 + $0xc8] sm:$0xff]  ;;  %v48_v25 = vld [vmem:[#allocation2 + $0x8] sm:$0xff]  ;;  %v249_v26 = vpack.c.bf16 %v56_v22, %v55_v21  ;;  %v57_v28 = vld [vmem:[#allocation5 + $0x40] sm:$0xff] }
  0x2e   :  { %145 = vmatprep.mubr.f32.mxu0 %v48_v25  ;;  %v251_v27 = vpack.c.bf16 %v74_v24, %v73_v23  ;;  %v58_v29 = vld [vmem:[#allocation5 + $0x48] sm:$0xff]  ;;  %v75_v30 = vld [vmem:[#allocation5 + $0xd0] sm:$0xff]  ;;  %v76_v31 = vld [vmem:[#allocation5 + $0xd8] sm:$0xff]  ;;  %p325_p5 = por %p324_p4, %p323_p3 }
  0x2f   :  { %242 = vmatpush3.bf16.msra.mxu0 %v241_v13  ;;  %v253_v32 = vpack.c.bf16 %v58_v29, %v57_v28  ;;  %v255_v33 = vpack.c.bf16 %v76_v31, %v75_v30  ;;  %v59_v34 = vld [vmem:[#allocation5 + $0x50] sm:$0xff]  ;;  %v60_v35 = vld [vmem:[#allocation5 + $0x58] sm:$0xff]  ;;  %v77_v36 = vld [vmem:[#allocation5 + $0xe0] sm:$0xff] }
  0x30   :  { %244 = vmatprep.subr.bf16.mxu0 %v243_v14  ;;  %v78_v37 = vld [vmem:[#allocation5 + $0xe8] sm:$0xff]  ;;  %v257_v38 = vpack.c.bf16 %v60_v35, %v59_v34  ;;  %v61_v40 = vld [vmem:[#allocation5 + $0x60] sm:$0xff]  ;;  %v79_v42 = vld [vmem:[#allocation5 + $0xf0] sm:$0xff]  ;;  %p326_p6 = pnand %p325_p5, %p319_p2 }
  0x31   :  { %v259_v39 = vpack.c.bf16 %v78_v37, %v77_v36  ;;  %v62_v41 = vld [vmem:[#allocation5 + $0x68] sm:$0xff]  ;;  %v80_v43 = vld [vmem:[#allocation5 + $0xf8] sm:$0xff]  ;;  %v63_v46 = vld [vmem:[#allocation5 + $0x70] sm:$0xff] }
  0x32   :  { %v261_v44 = vpack.c.bf16 %v62_v41, %v61_v40  ;;  %v263_v45 = vpack.c.bf16 %v80_v43, %v79_v42  ;;  %v64_v47 = vld [vmem:[#allocation5 + $0x78] sm:$0xff]  ;;  %v47_v49 = vld [vmem:[#allocation2] sm:$0xff]  ;;  %v151_v0 = vld [vmem:[#allocation7] sm:$0x1] }
  0x33   :  { %246 = vmatpush3.bf16.msra.mxu0 %v245_v19  ;;  %v265_v48 = vpack.c.bf16 %v64_v47, %v63_v46  ;;  %v160_v3 = vld [vmem:[#allocation8] sm:$0x1] }
  0x34   :  { %248 = vmatprep.subr.bf16.mxu0 %v247_v20 }
  0x37   :  { %250 = vmatpush3.bf16.msra.mxu0 %v249_v26 }
  0x38   :  { %252 = vmatprep.subr.bf16.mxu0 %v251_v27 }
  0x3b   :  { %254 = vmatpush3.bf16.msra.mxu0 %v253_v32 }
  0x3c   :  { %256 = vmatprep.subr.bf16.mxu0 %v255_v33 }
  0x3f   :  { %258 = vmatpush3.bf16.msra.mxu0 %v257_v38 }
  0x40   :  { %260 = vmatprep.subr.bf16.mxu0 %v259_v39 }
  0x43   :  { %262 = vmatpush3.bf16.msra.mxu0 %v261_v44 }
  0x44   :  { %264 = vmatprep.subr.bf16.mxu0 %v263_v45 }
  0x47   :  { %266 = vmatpush3.bf16.msra.mxu0 %v265_v48 }
  0x4a   :  { %146 = vmatmul.mubr.f32.vlgmr.msra.gmra.mrb[0].mxu0 %v47_v49 }
 0x11d   :  { %v232_v51 = vpop.f32.mrb[0].mxu0 }
 0x11e   :  { %v233_v52 = vpop.f32.mrb[1].mxu0 }
 0x11f   :  { %v234_v53 = vadd.f32 %v233_v52, %v232_v51 }
 0x121   :  { %v152_v54 = vrot.slane %v234_v53, 4  ;;  %v161_v55 = vmul.f32 %v234_v53, %v234_v53 }
 0x123   :  { %v153_v56 = vadd.f32 %v234_v53, %v152_v54  ;;  %v162_v57 = vrot.slane %v161_v55, 4 }
 0x125   :  { %v154_v58 = vrot.slane %v153_v56, 2  ;;  %v163_v59 = vadd.f32 %v162_v57, %v161_v55 }
 0x127   :  { %v155_v60 = vadd.f32 %v154_v58, %v153_v56  ;;  %v164_v61 = vrot.slane %v163_v59, 2 }
 0x129   :  { %v156_v62 = vrot.slane %v155_v60, 1  ;;  %v165_v63 = vadd.f32 %v164_v61, %v163_v59 }
 0x12b   :  { %v157_v1 = vadd.f32 %v156_v62, %v155_v60  ;;  %v166_v2 = vrot.slane %v165_v63, 1 }
 0x12d   :  { %v158_v4 = vadd.f32 %v157_v1, %v151_v0  ;;  %v167_v5 = vadd.f32 %v166_v2, %v165_v63 }
 0x12f   :  { %159 = vst [vmem:[#allocation7] sm:$0x1] %v158_v4  ;;  %v168_v6 = vadd.f32 %v167_v5, %v160_v3 }
 0x130   :  { %329 = shalt.err (!%p326_p6)
}
 0x131   :  { %s330_s17 = scalar_lea.hbm %s462_s2, 16 }
 0x132   :  { %p331_p7 = scmp.ne.s32.totalorder %s462_s2, %s330_s17  ;;  %p334_p8 = scmp.lt.u32.totalorder %s330_s17, %s462_s2 }
 0x134   :  { %p336_p9 = pnand %p334_p8, %p331_p7 }
 0x136   :  { %339 = shalt.err (!%p336_p9)
}
 0x137   :  { %179 = dma.vmem_to_hbm [thread:$0]  %s177_s10, 16, %s462_s2, [#allocation4]   ;;  %169 = vst [vmem:[#allocation8] sm:$0x1] %v168_v6 }
 0x138   :  { %s340_s24 = scalar_lea.vmem %s428_s12, 16  ;;  %s344_s25 = scalar_lea.vmem %s428_s12, 32 }
 0x139   :  { %p341_p10 = scmp.ne.s32.totalorder %s428_s12, %s340_s24  ;;  %p345_p11 = scmp.lt.s32.totalorder %s428_s12, %s428_s12 }
 0x13a   :  { %p346_p12 = scmp.lt.s32.totalorder %s344_s25, %s340_s24 }
 0x13c   :  { %p347_p13 = por %p346_p12, %p345_p11 }
 0x13e   :  { %p348_p0 = pnand %p347_p13, %p341_p10 }
 0x140   :  { %351 = shalt.err (!%p348_p0)
}
 0x141   :  { %s352_s28 = scalar_lea.hbm %s463_s3, 16 }
 0x142   :  { %p353_p1 = scmp.ne.s32.totalorder %s463_s3, %s352_s28  ;;  %p356_p2 = scmp.lt.u32.totalorder %s352_s28, %s463_s3 }
 0x144   :  { %p358_p3 = pnand %p356_p2, %p353_p1 }
 0x146   :  { %361 = shalt.err (!%p358_p3)
}
 0x147   :  { %189 = dma.vmem_to_hbm [thread:$0]  %s428_s12, 16, %s463_s3, [#allocation9]  }
 0x148   :  { %366 = dma.done.wait [#allocation4], 16  }
 0x149   :  { %367 = vsyncadd [#allocation4], 4294967280 }
 0x14a   :  { %368 = dma.done.wait [#allocation9], 16  }
 0x14b   :  { %369 = vsyncadd [#allocation9], 4294967280 }
 0x14c   :  { %196 = vsyncpa [#allocation3], 1 }
 0x14d   :  { %197 = vsyncpa [#allocation6], 1 }
 0x14e   :  { %198 = vsyncpa [#allocation4], 1 }
 0x14f   :  { %199 = vsyncpa [#allocation9], 1 }

</bundles_post_ra>
